<compile_context>
chip_gen: v7x
topology: tpu7x:2x2x1
jax: 0.10.0
libtpu: 0.0.40
codegen_flags: <defaults>
</compile_context>

<pallas_src>
import functools

import jax
import jax.numpy as jnp
from jax.experimental import pallas as pl
from jax.experimental.pallas import tpu as pltpu


# ---------------------------------------------------------------------------
# Fused TemporalBlock kernel (one batch element per grid step).
# ---------------------------------------------------------------------------
def _shifted_stack(v, K, dilation, L):
    """(C, L) -> (K*C, L) stack of causally shifted copies of v.

    Row block k (rows [k*C, (k+1)*C)) holds column t = v[:, t + k*d - (K-1)*d]
    with zeros where the index is negative — i.e. exactly the receptive field of
    Conv1d(padding=(K-1)*dilation) followed by Chomp1d.
    """
    pad = (K - 1) * dilation
    parts = []
    for k in range(K):
        s = pad - k * dilation                       # static right-shift amount
        if s == 0:
            parts.append(v)
        else:
            zeros = jnp.zeros((v.shape[0], s), v.dtype)
            parts.append(jnp.concatenate([zeros, v[:, :L - s]], axis=1))
    return jnp.concatenate(parts, axis=0) if K > 1 else parts[0]


def _temporal_block_kernel(x_ref, w1_ref, b1_ref, w2_ref, b2_ref, *rest,
                           K, dilation, L, has_downsample, compute_dtype):
    if has_downsample:
        wds_ref, bds_ref, o_ref = rest
    else:
        (o_ref,) = rest

    xb = x_ref[0].astype(compute_dtype)                       # (C_in, L) bf16

    # conv1 -> ReLU : single MXU matmul (C_mid, K*C_in) x (K*C_in, L), f32 acc.
    h = jnp.dot(w1_ref[...], _shifted_stack(xb, K, dilation, L),
                preferred_element_type=jnp.float32) + b1_ref[...]
    h = jnp.maximum(h, 0.0).astype(compute_dtype)             # (C_mid, L)

    # conv2 -> ReLU : single MXU matmul (C_out, K*C_mid) x (K*C_mid, L).
    out = jnp.dot(w2_ref[...], _shifted_stack(h, K, dilation, L),
                  preferred_element_type=jnp.float32) + b2_ref[...]
    out = jnp.maximum(out, 0.0)                               # (C_out, L) f32

    # residual branch (identity or 1x1 downsample conv) + final ReLU.
    if has_downsample:
        res = jnp.dot(wds_ref[...], xb,
                      preferred_element_type=jnp.float32) + bds_ref[...]
    else:
        res = x_ref[0].astype(jnp.float32)
    o_ref[0] = jnp.maximum(out + res, 0.0).astype(o_ref.dtype)


def tcn_temporal_block(x, p, dilation, *, compute_dtype=jnp.bfloat16):
    """Fused TCN_TemporalBlock forward: x (N, C_in, L) -> (N, C_out, L)."""
    N, C_in, L = x.shape
    C_mid, _, K = p["w1"].shape
    C_out = p["w2"].shape[0]

    # Lane-dense weight packing: (C_out, K*C_in); row-block order matches the
    # shifted-input stack built in the kernel.  bf16 operands, f32 biases.
    w1 = jnp.transpose(p["w1"], (0, 2, 1)).reshape(C_mid, K * C_in)
    w2 = jnp.transpose(p["w2"], (0, 2, 1)).reshape(C_out, K * C_mid)
    w1 = w1.astype(compute_dtype)
    w2 = w2.astype(compute_dtype)
    b1 = p["b1"].reshape(C_mid, 1).astype(jnp.float32)
    b2 = p["b2"].reshape(C_out, 1).astype(jnp.float32)

    has_ds = p["w_ds"] is not None
    args = [x, w1, b1, w2, b2]
    in_specs = [
        pl.BlockSpec((1, C_in, L), lambda n: (n, 0, 0)),
        pl.BlockSpec((C_mid, K * C_in), lambda n: (0, 0)),    # resident weights
        pl.BlockSpec((C_mid, 1), lambda n: (0, 0)),
        pl.BlockSpec((C_out, K * C_mid), lambda n: (0, 0)),
        pl.BlockSpec((C_out, 1), lambda n: (0, 0)),
    ]
    if has_ds:
        w_ds = p["w_ds"][:, :, 0].astype(compute_dtype)       # (C_out, C_in)
        b_ds = p["b_ds"].reshape(C_out, 1).astype(jnp.float32)
        args += [w_ds, b_ds]
        in_specs += [
            pl.BlockSpec((C_out, C_in), lambda n: (0, 0)),
            pl.BlockSpec((C_out, 1), lambda n: (0, 0)),
        ]

    kernel = functools.partial(
        _temporal_block_kernel, K=K, dilation=dilation, L=L,
        has_downsample=has_ds, compute_dtype=compute_dtype)

    # TODO(synk): for very long sequences, add an L-tile grid axis with a
    #             2*(K-1)*dilation halo so per-step buffers stay within the
    #             per-generation VMEM budget (64 MiB physical on v7x).
    return pl.pallas_call(
        kernel,
        out_shape=jax.ShapeDtypeStruct((N, C_out, L), x.dtype),
        grid=(N,),
        in_specs=in_specs,
        out_specs=pl.BlockSpec((1, C_out, L), lambda n: (n, 0, 0)),
        compiler_params=pltpu.CompilerParams(
            dimension_semantics=("parallel",),     # v7x: shard batch over 2 TCs
            vmem_limit_bytes=32 * 1024 * 1024,     # safe on v5e / v6e / v7x
        ),
    )(*args)


# ---------------------------------------------------------------------------
# Parameter construction (deterministic, in-script).
# ---------------------------------------------------------------------------
def _weight_norm(v):
    """Effective weight of nn.utils.weight_norm: g * v / ||v||, norm over (in,k)."""
    norm = jnp.sqrt(jnp.sum(v * v, axis=(1, 2), keepdims=True))
    g = norm                     # weight_norm initializes g to ||v||
    return g * v / (norm + 1e-12)


def init_params(key, num_inputs, num_channels, kernel_size=2):
    params = []
    c_in = num_inputs
    for c_out in num_channels:
        key, k1, k2, k3, k4, k5, k6 = jax.random.split(key, 7)
        v1 = 0.05 * jax.random.normal(k1, (c_out, c_in, kernel_size), jnp.float32)
        v2 = 0.05 * jax.random.normal(k2, (c_out, c_out, kernel_size), jnp.float32)
        p = {
            "w1": _weight_norm(v1),
            "b1": 0.01 * jax.random.normal(k3, (c_out,), jnp.float32),
            "w2": _weight_norm(v2),
            "b2": 0.01 * jax.random.normal(k4, (c_out,), jnp.float32),
        }
        if c_in != c_out:
            p["w_ds"] = 0.01 * jax.random.normal(k5, (c_out, c_in, 1), jnp.float32)
            p["b_ds"] = 0.01 * jax.random.normal(k6, (c_out,), jnp.float32)
        else:
            p["w_ds"] = None
            p["b_ds"] = None
        params.append(p)
        c_in = c_out
    return params


def temporal_conv_net_forward(x, params):
    """Stack of fused TCN_TemporalBlocks (dilation 2**i), one pallas_call each."""
    for i, p in enumerate(params):
        x = tcn_temporal_block(x, p, dilation=2 ** i)
    return x


# ---------------------------------------------------------------------------
# Pure-JAX reference for correctness checking.
# ---------------------------------------------------------------------------
def _ref_causal_conv(x, w, b, d):
    K = w.shape[-1]
    pad = (K - 1) * d
    xp = jnp.pad(x, ((0, 0), (0, 0), (pad, 0)))
    L = x.shape[-1]
    out = jnp.broadcast_to(b[None, :, None], (x.shape[0], w.shape[0], L))
    out = out.astype(jnp.float32)
    for k in range(K):
        out = out + jnp.einsum("oc,ncl->nol", w[:, :, k],
                               xp[:, :, k * d:k * d + L],
                               precision=jax.lax.Precision.HIGHEST)
    return out


def _ref_forward(x, params, compute_dtype=None):
    """Reference TCN.  With compute_dtype set, mimics the kernel's rounding
    points (bf16 operands, f32 accumulation) for a tight wiring check."""
    def rnd(a):
        return a.astype(compute_dtype).astype(jnp.float32) if compute_dtype else a
    for i, p in enumerate(params):
        d = 2 ** i
        xr = rnd(x)
        h = jax.nn.relu(_ref_causal_conv(xr, rnd(p["w1"]), p["b1"], d))
        out = jax.nn.relu(_ref_causal_conv(rnd(h), rnd(p["w2"]), p["b2"], d))
        if p["w_ds"] is None:
            res = x
        else:
            res = _ref_causal_conv(xr, rnd(p["w_ds"]), p["b_ds"], 1)
        x = jax.nn.relu(out + res)
    return x


if __name__ == "__main__":
    key = jax.random.PRNGKey(0)
    k_x, k_p = jax.random.split(key)

    # Small but lane-dense shapes: L is a multiple of 128 -> unmasked stores.
    N, C_in, L = 2, 4, 128
    num_channels = [8, 8]      # block 1: 4->8 (1x1 downsample), block 2: identity
    kernel_size = 2            # dilations 1 and 2

    x = jax.random.normal(k_x, (N, C_in, L), jnp.float32)
    params = init_params(k_p, C_in, num_channels, kernel_size)

    out = temporal_conv_net_forward(x, params)
    out = jax.block_until_ready(out)
    assert out.shape == (N, num_channels[-1], L)

    # (1) tight wiring check vs a reference with identical bf16 rounding points.
    ref_bf16 = _ref_forward(x, params, compute_dtype=jnp.bfloat16)
    err = float(jnp.max(jnp.abs(out - ref_bf16)))
    assert err < 1e-3, f"Pallas output != bf16-matched reference (max err {err})"

    # (2) semantics check vs the pure-f32 PyTorch-equivalent reference.
    ref_f32 = _ref_forward(x, params)
    err32 = float(jnp.max(jnp.abs(out - ref_f32)))
    assert err32 < 5e-2, f"Pallas output != f32 reference (max err {err32})"

    print("KERNEL_OK")
</pallas_src>

<mosaic_0001>
module attributes {stable_mosaic.version = 11 : i64} {
  func.func @_temporal_block_kernel(%arg0: i32, %arg1: memref<1x4x128xf32, #tpu.memory_space<vmem>>, %arg2: memref<8x8xbf16, #tpu.memory_space<vmem>>, %arg3: memref<8x1xf32, #tpu.memory_space<vmem>>, %arg4: memref<8x16xbf16, #tpu.memory_space<vmem>>, %arg5: memref<8x1xf32, #tpu.memory_space<vmem>>, %arg6: memref<8x4xbf16, #tpu.memory_space<vmem>>, %arg7: memref<8x1xf32, #tpu.memory_space<vmem>>, %arg8: memref<1x8x128xf32, #tpu.memory_space<vmem>>) attributes {dimension_semantics = [#tpu.dimension_semantics<parallel>], iteration_bounds = array<i64: 2>, scalar_prefetch = 0 : i64, scratch_operands = 0 : i64, tpu.core_type = #tpu.core_type<tc>, window_params = [{transform_indices = @transform_0, window_bounds = array<i64: 1, 4, 128>}, {pipeline_mode = #tpu.pipeline_mode<synchronous>, transform_indices = @transform_1, window_bounds = array<i64: 8, 8>}, {pipeline_mode = #tpu.pipeline_mode<synchronous>, transform_indices = @transform_2, window_bounds = array<i64: 8, 1>}, {pipeline_mode = #tpu.pipeline_mode<synchronous>, transform_indices = @transform_3, window_bounds = array<i64: 8, 16>}, {pipeline_mode = #tpu.pipeline_mode<synchronous>, transform_indices = @transform_4, window_bounds = array<i64: 8, 1>}, {pipeline_mode = #tpu.pipeline_mode<synchronous>, transform_indices = @transform_5, window_bounds = array<i64: 8, 4>}, {pipeline_mode = #tpu.pipeline_mode<synchronous>, transform_indices = @transform_6, window_bounds = array<i64: 8, 1>}, {transform_indices = @transform_7, window_bounds = array<i64: 1, 8, 128>}]} {
    %c0 = arith.constant 0 : index
    %c0_0 = arith.constant 0 : index
    %c0_1 = arith.constant 0 : index
    %0 = vector.load %arg1[%c0, %c0_0, %c0_1] : memref<1x4x128xf32, #tpu.memory_space<vmem>>, vector<1x4x128xf32>
    %1 = vector.shape_cast %0 : vector<1x4x128xf32> to vector<4x128xf32>
    %2 = arith.truncf %1 : vector<4x128xf32> to vector<4x128xbf16>
    %c0_2 = arith.constant 0 : index
    %c0_3 = arith.constant 0 : index
    %3 = vector.load %arg2[%c0_2, %c0_3] : memref<8x8xbf16, #tpu.memory_space<vmem>>, vector<8x8xbf16>
    %cst = arith.constant 0.000000e+00 : bf16
    %4 = vector.broadcast %cst : bf16 to vector<4x1xbf16>
    %5 = vector.extract_strided_slice %2 {offsets = [0, 0], sizes = [4, 127], strides = [1, 1]} : vector<4x128xbf16> to vector<4x127xbf16>
    %6 = tpu.concatenate %4, %5 in 1 : vector<4x1xbf16>, vector<4x127xbf16> -> vector<4x128xbf16>
    %7 = tpu.concatenate %6, %2 in 0 : vector<4x128xbf16>, vector<4x128xbf16> -> vector<8x128xbf16>
    %cst_4 = arith.constant dense<0.000000e+00> : vector<8x128xf32>
    %8 = tpu.matmul %3, %7, %cst_4 {dimension_numbers = #tpu.dot_dimension_numbers<[1], [0], [0], [1], [0, 0, 1, 1], [], []>} : vector<8x8xbf16>, vector<8x128xbf16>, vector<8x128xf32> -> vector<8x128xf32>
    %c0_5 = arith.constant 0 : index
    %c0_6 = arith.constant 0 : index
    %9 = vector.load %arg3[%c0_5, %c0_6] : memref<8x1xf32, #tpu.memory_space<vmem>>, vector<8x1xf32>
    %10 = vector.broadcast %9 : vector<8x1xf32> to vector<8x128xf32>
    %11 = arith.addf %8, %10 : vector<8x128xf32>
    %cst_7 = arith.constant 0.000000e+00 : f32
    %12 = vector.broadcast %cst_7 : f32 to vector<8x128xf32>
    %13 = arith.maximumf %11, %12 : vector<8x128xf32>
    %14 = arith.truncf %13 : vector<8x128xf32> to vector<8x128xbf16>
    %c0_8 = arith.constant 0 : index
    %c0_9 = arith.constant 0 : index
    %15 = vector.load %arg4[%c0_8, %c0_9] : memref<8x16xbf16, #tpu.memory_space<vmem>>, vector<8x16xbf16>
    %cst_10 = arith.constant 0.000000e+00 : bf16
    %16 = vector.broadcast %cst_10 : bf16 to vector<8x1xbf16>
    %17 = vector.extract_strided_slice %14 {offsets = [0, 0], sizes = [8, 127], strides = [1, 1]} : vector<8x128xbf16> to vector<8x127xbf16>
    %18 = tpu.concatenate %16, %17 in 1 : vector<8x1xbf16>, vector<8x127xbf16> -> vector<8x128xbf16>
    %19 = tpu.concatenate %18, %14 in 0 : vector<8x128xbf16>, vector<8x128xbf16> -> vector<16x128xbf16>
    %cst_11 = arith.constant dense<0.000000e+00> : vector<8x128xf32>
    %20 = tpu.matmul %15, %19, %cst_11 {dimension_numbers = #tpu.dot_dimension_numbers<[1], [0], [0], [1], [0, 0, 1, 1], [], []>} : vector<8x16xbf16>, vector<16x128xbf16>, vector<8x128xf32> -> vector<8x128xf32>
    %c0_12 = arith.constant 0 : index
    %c0_13 = arith.constant 0 : index
    %21 = vector.load %arg5[%c0_12, %c0_13] : memref<8x1xf32, #tpu.memory_space<vmem>>, vector<8x1xf32>
    %22 = vector.broadcast %21 : vector<8x1xf32> to vector<8x128xf32>
    %23 = arith.addf %20, %22 : vector<8x128xf32>
    %cst_14 = arith.constant 0.000000e+00 : f32
    %24 = vector.broadcast %cst_14 : f32 to vector<8x128xf32>
    %25 = arith.maximumf %23, %24 : vector<8x128xf32>
    %c0_15 = arith.constant 0 : index
    %c0_16 = arith.constant 0 : index
    %26 = vector.load %arg6[%c0_15, %c0_16] : memref<8x4xbf16, #tpu.memory_space<vmem>>, vector<8x4xbf16>
    %cst_17 = arith.constant dense<0.000000e+00> : vector<8x128xf32>
    %27 = tpu.matmul %26, %2, %cst_17 {dimension_numbers = #tpu.dot_dimension_numbers<[1], [0], [0], [1], [0, 0, 1, 1], [], []>} : vector<8x4xbf16>, vector<4x128xbf16>, vector<8x128xf32> -> vector<8x128xf32>
    %c0_18 = arith.constant 0 : index
    %c0_19 = arith.constant 0 : index
    %28 = vector.load %arg7[%c0_18, %c0_19] : memref<8x1xf32, #tpu.memory_space<vmem>>, vector<8x1xf32>
    %29 = vector.broadcast %28 : vector<8x1xf32> to vector<8x128xf32>
    %30 = arith.addf %27, %29 : vector<8x128xf32>
    %31 = arith.addf %25, %30 : vector<8x128xf32>
    %cst_20 = arith.constant 0.000000e+00 : f32
    %32 = vector.broadcast %cst_20 : f32 to vector<8x128xf32>
    %33 = arith.maximumf %31, %32 : vector<8x128xf32>
    %c0_21 = arith.constant 0 : index
    %c0_22 = arith.constant 0 : index
    %c0_23 = arith.constant 0 : index
    %34 = vector.load %arg8[%c0_21, %c0_22, %c0_23] : memref<1x8x128xf32, #tpu.memory_space<vmem>>, vector<1x8x128xf32>
    %35 = vector.shape_cast %34 : vector<1x8x128xf32> to vector<8x128xf32>
    %36 = vector.shape_cast %33 : vector<8x128xf32> to vector<1x8x128xf32>
    tpu.vector_store %arg8[%c0_21, %c0_22, %c0_23], %36 {strides = array<i32>} : memref<1x8x128xf32, #tpu.memory_space<vmem>>, vector<1x8x128xf32>,
    return
  }
  func.func @transform_0(%arg0: i32) -> (i32, i32, i32) {
    %c0_i32 = arith.constant 0 : i32
    %c0_i32_0 = arith.constant 0 : i32
    %c0_i32_1 = arith.constant 0 : i32
    return %arg0, %c0_i32, %c0_i32_0 : i32, i32, i32
  }
  func.func @transform_1(%arg0: i32) -> (i32, i32) {
    %c0_i32 = arith.constant 0 : i32
    %c0_i32_0 = arith.constant 0 : i32
    %c0_i32_1 = arith.constant 0 : i32
    return %c0_i32, %c0_i32_0 : i32, i32
  }
  func.func @transform_2(%arg0: i32) -> (i32, i32) {
    %c0_i32 = arith.constant 0 : i32
    %c0_i32_0 = arith.constant 0 : i32
    %c0_i32_1 = arith.constant 0 : i32
    return %c0_i32, %c0_i32_0 : i32, i32
  }
  func.func @transform_3(%arg0: i32) -> (i32, i32) {
    %c0_i32 = arith.constant 0 : i32
    %c0_i32_0 = arith.constant 0 : i32
    %c0_i32_1 = arith.constant 0 : i32
    return %c0_i32, %c0_i32_0 : i32, i32
  }
  func.func @transform_4(%arg0: i32) -> (i32, i32) {
    %c0_i32 = arith.constant 0 : i32
    %c0_i32_0 = arith.constant 0 : i32
    %c0_i32_1 = arith.constant 0 : i32
    return %c0_i32, %c0_i32_0 : i32, i32
  }
  func.func @transform_5(%arg0: i32) -> (i32, i32) {
    %c0_i32 = arith.constant 0 : i32
    %c0_i32_0 = arith.constant 0 : i32
    %c0_i32_1 = arith.constant 0 : i32
    return %c0_i32, %c0_i32_0 : i32, i32
  }
  func.func @transform_6(%arg0: i32) -> (i32, i32) {
    %c0_i32 = arith.constant 0 : i32
    %c0_i32_0 = arith.constant 0 : i32
    %c0_i32_1 = arith.constant 0 : i32
    return %c0_i32, %c0_i32_0 : i32, i32
  }
  func.func @transform_7(%arg0: i32) -> (i32, i32, i32) {
    %c0_i32 = arith.constant 0 : i32
    %c0_i32_0 = arith.constant 0 : i32
    %c0_i32_1 = arith.constant 0 : i32
    return %arg0, %c0_i32, %c0_i32_0 : i32, i32, i32
  }
}

</mosaic_0001>

<bundles_post_ra>
// kernel: tpu_custom_call.1
= control target key start
LH: loop header
LB: loop body
LE: loop exit
PB: predicated region body
PF: predicated region fallthrough
CT: control target
= control target key end

     0   :  { %12 = vsyncpa [#allocation3], 0  ;;  %s853_s0 = inlined_call_operand.vmem [shape: f32[2,4,128], index: 0, kind: input, shape index: {}]   ;;  %s854_s1 = inlined_call_operand.vmem [shape: bf16[8,8], index: 1, kind: input, shape index: {}]   ;;  %s855_s2 = inlined_call_operand.vmem [shape: f32[8,1], index: 2, kind: input, shape index: {}]   ;;  %s856_s3 = inlined_call_operand.vmem [shape: bf16[8,16], index: 3, kind: input, shape index: {}]   ;;  %s857_s4 = inlined_call_operand.vmem [shape: f32[8,1], index: 4, kind: input, shape index: {}]   ;;  %s858_s5 = inlined_call_operand.vmem [shape: bf16[8,4], index: 5, kind: input, shape index: {}]   ;;  %s859_s6 = inlined_call_operand.vmem [shape: f32[8,1], index: 6, kind: input, shape index: {}]   ;;  %s860_s7 = inlined_call_operand.hbm [shape: f32[2,8,128], index: 7, kind: output, shape index: {}]  }
   0x1   :  { %14 = vsyncpa [#allocation3 + $0x1], 0  ;;  %s726_s24 = smov 0   ;;  %s728_s25 = smov 0  }
   0x2   :  { %s730_s26 = smov 0   ;;  %s732_s27 = smov 0  }
   0x3 LB: > { %s747_s28 = sadd.s32 4294967295, %s679_s27   ;;  %s535_s29 = sadd.s32 4294967294, %s679_s27   ;;  %s679_s27 = sphi %s732_s27, %s866_s27   ;;  %s675_s26 = sphi %s730_s26, %s865_s26   ;;  %s671_s25 = sphi %s728_s25, %s864_s25   ;;  %s667_s24 = sphi %s726_s24, %s863_s24  }
   0x4   : > { %s751_s30 = sadd.s32 1, %s679_s27   ;;  %s179_s8 = sadd.s32 1, %s675_s26 }
   0x5   : > { %s176_s9 = ssub.s32 %s679_s27, %s751_s30  ;;  %p189_p0 = scmp.ne.s32.totalorder %s675_s26, %s671_s25 }
   0x6   : > { %p177_p1 = scmp.eq.s32.totalorder %s176_s9, 0  ;;  %p190_p2 = scmp.eq.s32.totalorder %s747_s28, 1 }
   0x7   : > { %p195_p3 = scmp.ne.s32.totalorder %s671_s25, %s667_s24  ;;  %p196_p4 = scmp.eq.s32.totalorder %s535_s29, 1 }
   0x8   : > { %s762_s10 = scalar_select %p177_p1, %s675_s26, %s179_s8  }
   0x9   : > { %p764_p5 = por %p190_p2, %p189_p0  ;;  %p768_p6 = por %p196_p4, %p195_p3 }
   0xa   : > { %p538_p7 = scmp.ge.s32.totalorder %s679_s27, 1  ;;  %p239_p8 = scmp.lt.s32.totalorder %s679_s27, 3 }
   0xc   : > { %p240_p9 = pnand %p538_p7, %p239_p8 }
   0xd   : > { %p270_p10 = scmp.lt.s32.totalorder (!%p240_p9), %s747_s28, 1  ;;  %v681_v0 = vmov (!%p240_p9), 0.0   ;;  %vm682_vm0 = vmmov (!%p240_p9), 0   ;;  %v683_v1 = vmov (!%p240_p9), 0   ;;  %s684_s18 = smov (!%p240_p9), 1   ;;  %v289_v4 = vld [vmem:[%s855_s2] sm:$0xff] (!%p240_p9) }
   0xe   : > { %243 = sbr.rel (%p240_p9) target bundleno = 721 (0x2d1), region = 48  ;;  %554 = vmatprep.subr.bf16.mxu0 (!%p240_p9), %v681_v0  ;;  %560 = vmatprep.subr.bf16.mxu1 (!%p240_p9), %v681_v0  ;;  %vm281_vm1 = vcmask (!%p240_p9), 7168   ;;  %vm286_vm2 = vcmask (!%p240_p9), 1041408   ;;  %vm299_vm3 = vcmask (!%p240_p9), 1043456   ;;  %v277_v10 = vld [vmem:[%s854_s1] sm:$0xf] (!%p240_p9) }
   0xf   : > { %556 = vmatprep.mubr.msk.bf16.mxu0 (!%p240_p9), %vm682_vm0, %v681_v0  ;;  %562 = vmatprep.mubr.msk.bf16.mxu1 (!%p240_p9), %vm682_vm0, %v681_v0  ;;  %vm295_vm4 = vcmask (!%p240_p9), 64512   ;;  %v405_v12 = vld [vmem:[%s858_s5] sm:$0xf] (!%p240_p9)  ;;  %vm412_vm5 = vcmask (!%p240_p9), 31744   ;;  %vm360_vm6 = vcmask (!%p240_p9), 130048   ;;  %s545_s19 = sshll.u32 (!%p240_p9), %s747_s28, 7 }
  0x10   : > { %615 = vset.pattern.permute.xlu0 (!%p240_p9), %v683_v1  ;;  %616 = vset.pattern.permute.xlu1 (!%p240_p9), %v683_v1  ;;  %v354_v21 = vld [vmem:[%s857_s4] sm:$0xff] (!%p240_p9)  ;;  %s811_s29 = scalar_lea.hbm (!%p240_p9), %s860_s7, %s545_s19 }
  0x11   : > { %v406_v22 = vld [vmem:[%s859_s6] sm:$0xff] (!%p240_p9) }
  0x12   : > { %v344_v27 = vld [vmem:[%s856_s3] sm:$0xf] (!%p240_p9) }
  0x15   : > { %s271_s13 = scalar_select %p270_p10, %s747_s28, 1 }
  0x16   : > { %s685_s28 = smov [#allocation2]  }
  0x17   : > { %s540_s14 = sshll.u32 %s271_s13, 2  ;;  %s621_s13 = sshll.u32 %s685_s28, 4  ;;  %s622_s13 = int_to_ptr.vmem [resolvable:$false] %s621_s13 }
  0x18   : > { %s273_s17 = scalar_lea.vmem %s853_s0, %s540_s14  ;;  %s623_s14 = scalar_lea.vmem %s622_s13, 256 }
  0x19   : > { %v275_v2 = vld [vmem:[%s273_s17] sm:$0xf]  ;;  %s267_s17 = sand.u32 1, %s671_s25  }
  0x1a   : > { %v276_v3 = vpack.c.bf16 %v275_v2, %v275_v2  ;;  %s463_s8 = scalar_lea.sflag [#allocation3], %s267_s17 }
  0x1c   : > { %279 = vrot.lane.b32.xlu0 %v276_v3, %s684_s18  ;;  %v285_v5 = vrot.slane %v276_v3, 6  ;;  %v417_v11 = vsel %vm286_vm2, %v276_v3, 0 }
  0x20   : > { %292 = vperm.xlu0 %615, %v289_v4  }
  0x8e   : > { %v280_v6 = vpop.permute.xlu0 %279 }
  0x8f   : > { %v284_v7 = vsel %vm281_vm1, 0, %v280_v6 }
  0x90   : > { %v288_v8 = vsel %vm286_vm2, %v284_v7, %v285_v5 }
  0x91   : > { %v300_v9 = vsel %vm299_vm3, %v288_v8, 0 }
  0x92   : > { %555 = vmatpush3.bf16.msra.mxu0 %v300_v9 }
  0x93   : > { %566 = vmatprep.subr.bf16.mxu0 %v681_v0 }
  0x95   : > { %557 = vmatmul.mubr.msk.bf16.vlgmr.msra.gmra.mrb[0].mxu0 %vm295_vm4, %v277_v10 }
  0x96   : > { %568 = vmatprep.mubr.msk.bf16.mxu0 %vm682_vm0, %v681_v0  ;;  %567 = vmatpush3.bf16.msra.mxu0 %v417_v11 }
  0x9d   : > { %569 = vmatmul.mubr.msk.bf16.vlgmr.msra.gmra.mrb[4].mxu0 %vm412_vm5, %v405_v12 }
  0x9f   : > { %v293_v13 = vpop.permute.xlu0 %292 }
 0x168   : > { %v336_v14 = vpop.f32.mrb[0].mxu0 }
 0x169   : > { %v337_v15 = vadd.f32 %v336_v14, %v293_v13  ;;  %v558_v16 = vpop.f32.mrb[1].mxu0 }
 0x16a   : > { %v339_v17 = vpop.f32.mrb[2].mxu0 }
 0x16b   : > { %v342_v18 = vmax.f32 %v337_v15, 0.0  ;;  %v559_v19 = vpop.f32.mrb[3].mxu0 }
 0x16d   : > { %v343_v20 = vpack.c.bf16 %v342_v18, %v342_v18 }
 0x16f   : > { %346 = vrot.lane.b32.xlu1 %v343_v20, %s684_s18  ;;  %v350_v23 = vrot.slane %v343_v20, 4  ;;  %s539_s18 = sshll.u32 %s267_s17, 3 }
 0x170   : > { %v453_v28 = vpop.f32.mrb[4].mxu0  ;;  %s269_s20 = scalar_lea.vmem [#allocation2], %s539_s18 }
 0x171   : > { %v570_v29 = vpop.f32.mrb[5].mxu0  ;;  %s476_s21 = sshll.u32 %s269_s20, 4  ;;  %s813_s21 = int_to_ptr.vmem [resolvable:$true] %s476_s21 }
 0x172   : > { %v456_v30 = vpop.f32.mrb[6].mxu0  ;;  %s617_s9 = scalar_lea.vmem %s813_s21, 128  ;;  %p624_p0 = scmp.lt.s32.totalorder %s813_s21, %s622_s13 }
 0x173   : > { %357 = vperm.xlu1 %616, %v354_v21   ;;  %v571_v31 = vpop.f32.mrb[7].mxu0  ;;  %p618_p11 = scmp.ne.s32.totalorder %s813_s21, %s617_s9  ;;  %p625_p1 = scmp.lt.s32.totalorder %s623_s14, %s617_s9 }
 0x175   : > { %p619_p12 = pnand %p618_p11, %p764_p5  ;;  %p626_p2 = por %p625_p1, %p624_p0 }
 0x177   : > { %409 = vperm.xlu1 %616, %v406_v22   ;;  %p620_p13 = pneg %p619_p12 }
 0x179   : > { %p627_p3 = pnand %p626_p2, %p620_p13 }
 0x1e1   : > { %v347_v24 = vpop.permute.xlu1 %346 }
 0x1e2   : > { %v349_v25 = vsel %vm281_vm1, 0, %v347_v24 }
 0x1e3   : > { %v352_v26 = vsel %vm299_vm3, %v349_v25, %v350_v23 }
 0x1e4   : > { %561 = vmatpush3.bf16.msra.mxu1 %v352_v26 }
 0x1e7   : > { %563 = vmatmul.mubr.msk.bf16.vlgmr.msra.gmra.mrb[0].mxu1 %vm360_vm6, %v344_v27 }
 0x1f2   : > { %v358_v32 = vpop.permute.xlu1 %357 }
 0x1f6   : > { %v410_v33 = vpop.permute.xlu1 %409 }
 0x1f7   : > { %v454_v38 = vadd.f32 %v453_v28, %v410_v33 }
 0x2ba   : > { %v398_v34 = vpop.f32.mrb[0].mxu1 }
 0x2bb   : > { %v399_v35 = vadd.f32 %v398_v34, %v358_v32  ;;  %v564_v36 = vpop.f32.mrb[1].mxu1 }
 0x2bc   : > { %v401_v37 = vpop.f32.mrb[2].mxu1 }
 0x2bd   : > { %v404_v39 = vmax.f32 %v399_v35, 0.0  ;;  %v565_v40 = vpop.f32.mrb[3].mxu1 }
 0x2bf   : > { %v459_v41 = vadd.f32 %v454_v38, %v404_v39 }
 0x2c1   : > { %v460_v42 = vmax.f32 %v459_v41, 0.0 }
 0x2c3   : > { %461 = vst [vmem:[%s269_s20] sm:$0xff] %v460_v42 }
 0x2c4   : > { %630 = shalt.err (!%p627_p3)
}
 0x2c5   : > { %s631_s15 = scalar_lea.hbm %s811_s29, 128  ;;  %s635_s18 = scalar_lea.hbm %s860_s7, 256 }
 0x2c6   : > { %p632_p4 = scmp.ne.s32.totalorder %s811_s29, %s631_s15  ;;  %p636_p9 = scmp.lt.u32.totalorder %s811_s29, %s860_s7 }
 0x2c7   : > { %p637_p10 = scmp.lt.u32.totalorder %s635_s18, %s631_s15  ;;  %p639_p12 = scmp.lt.u32.totalorder %s631_s15, %s811_s29 }
 0x2c8   : > { %p633_p7 = pnand %p632_p4, %p764_p5 }
 0x2c9   : > { %p638_p11 = por %p637_p10, %p636_p9 }
 0x2ca   : > { %p634_p8 = pneg %p633_p7 }
 0x2cb   : > { %p640_p13 = por %p639_p12, %p638_p11 }
 0x2cd   : > { %p641_p0 = pnand %p640_p13, %p634_p8 }
 0x2cf   : > { %644 = shalt.err (!%p641_p0)
}
 0x2d0   : > { %572 = dma.vmem_to_hbm [thread:$0]  (%p764_p5), %s813_s21, 128, %s811_s29, %s463_s8  }
 0x2d1 PF: > { %p578_p1 = scmp.ge.s32.totalorder %s679_s27, 2  ;;  %s488_s22 = sand.u32 1, %s667_s24  }
 0x2d2   : > { %s489_s23 = scalar_lea.sflag [#allocation3], %s488_s22 }
 0x2d3   : > { %p575_p2 = pnand %p578_p1, %p768_p6 }
 0x2d5   : > { %662 = dma.done.wait (!%p575_p2), %s489_s23, 128  }
 0x2d6   : > { %664 = vsyncadd (!%p575_p2), %s489_s23, 4294967168  ;;  %p17_p3 = scmp.ge.s32.totalorder %s751_s30, 4   ;;  %s863_s24 = smov %s671_s25 }
 0x2d7   : > { %s864_s25 = smov %s675_s26  ;;  %s865_s26 = smov %s762_s10 }
 0x2d8   : > { %s866_s27 = smov %s751_s30  ;;  %19 = sbr.rel (!%p17_p3) target bundleno = 3 (0x3), region = 83 }
 0x2df   :  { %494 = vsyncpa [#allocation3], 1 }
 0x2e0   :  { %496 = vsyncpa [#allocation3 + $0x1], 1 }

</bundles_post_ra>
